<compile_context>
chip_gen: v7x
topology: tpu7x:2x2x1
jax: 0.10.0
libtpu: 0.0.40
codegen_flags: <defaults>
</compile_context>

<pallas_src>
import functools

import jax
import jax.numpy as jnp
from jax.experimental import pallas as pl
from jax.experimental.pallas import tpu as pltpu

EPS = 1e-5   # nn.BatchNorm1d default
LANE = 128   # TPU lane width


# ----------------------------- fused kernel ---------------------------------


def _mlp_kernel(*refs, num_layers, inv_batch):
    """refs = (x, w0, b0, [gamma_i, beta_i, w_i, b_i] * num_layers, o_ref).

    All weights are pre-transposed to [in, out]; the last weight/bias are
    zero-padded on the lane axis so the single output store is lane-dense.
    """
    x_ref = refs[0]
    o_ref = refs[-1]
    p = refs[1:-1]

    # First Linear.
    y = jnp.dot(x_ref[...], p[0][...], preferred_element_type=jnp.float32) + p[1][...]

    idx = 2
    for _ in range(num_layers):
        gamma = p[idx][...]
        beta = p[idx + 1][...]
        w = p[idx + 2][...]
        b = p[idx + 3][...]
        idx += 4

        # BatchNorm1d (training-mode stats, biased variance) — one-pass moments on
        # (1, H) row vectors, then a single fused affine on the (B, H) activation.
        mean = jnp.sum(y, axis=0, keepdims=True) * inv_batch
        ex2 = jnp.sum(y * y, axis=0, keepdims=True) * inv_batch
        var = ex2 - mean * mean
        scale = gamma * jax.lax.rsqrt(var + EPS)     # (1, H): cheap, EUP rsqrt
        shift = beta - mean * scale                  # (1, H)
        z = jnp.maximum(y * scale + shift, 0.0)      # affine BN + ReLU

        # Linear.
        y = jnp.dot(z, w, preferred_element_type=jnp.float32) + b

    o_ref[...] = y  # lane-padded -> unmasked, lane-dense store


# ----------------------------- parameters -----------------------------------


def init_mlp_params(key, input_size, num_layers, hidden, output_size):
    """nn.Linear-style init; weights kept in PyTorch [out, in] layout (for reference)."""
    dims = (
        [(input_size, hidden)]
        + [(hidden, hidden)] * (num_layers - 1)
        + [(hidden, output_size)]
    )
    linears = []
    for fan_in, fan_out in dims:
        key, kw, kb = jax.random.split(key, 3)
        bound = 1.0 / jnp.sqrt(float(fan_in))
        w = jax.random.uniform(kw, (fan_out, fan_in), jnp.float32, -bound, bound)
        b = jax.random.uniform(kb, (fan_out,), jnp.float32, -bound, bound)
        linears.append((w, b))
    bns = [
        (jnp.ones((hidden,), jnp.float32), jnp.zeros((hidden,), jnp.float32))
        for _ in range(num_layers)
    ]
    return {"linears": linears, "bns": bns}


def prepare_kernel_params(params):
    """One-time layout prep (outside the jitted forward):
       - transpose every weight to [in, out],
       - zero-pad the final Linear's output dim to a multiple of 128 lanes."""
    linears = params["linears"]
    bns = params["bns"]
    w0, b0 = linears[0]
    kp = {"w0": jnp.asarray(w0.T), "b0": b0.reshape(1, -1), "stages": []}
    n_stage = len(bns)
    for i, (gamma, beta) in enumerate(bns):
        w, b = linears[i + 1]
        wt = jnp.asarray(w.T)              # [in, out]
        bb = b.reshape(1, -1)
        if i == n_stage - 1:               # last Linear -> lane-dense padded output
            out = wt.shape[1]
            out_pad = ((out + LANE - 1) // LANE) * LANE
            wt = jnp.pad(wt, ((0, 0), (0, out_pad - out)))
            bb = jnp.pad(bb, ((0, 0), (0, out_pad - out)))
        kp["stages"].append((gamma.reshape(1, -1), beta.reshape(1, -1), wt, bb))
    return kp


# ----------------------------- forward --------------------------------------


@functools.partial(jax.jit, static_argnames=("output_size",))
def mlp_forward(x, kparams, *, output_size):
    b = x.shape[0]
    x2 = x.reshape(b, -1).astype(jnp.float32)  # x.reshape(x.size(0), -1)

    args = [x2, kparams["w0"], kparams["b0"]]
    for stage in kparams["stages"]:
        args.extend(stage)
    num_layers = len(kparams["stages"])
    out_pad = kparams["stages"][-1][2].shape[1]

    kernel = functools.partial(
        _mlp_kernel, num_layers=num_layers, inv_batch=1.0 / float(b)
    )
    out_padded = pl.pallas_call(
        kernel,
        out_shape=jax.ShapeDtypeStruct((b, out_pad), jnp.float32),
        # Single grid point; whole batch + all params resident in VMEM (tiny shapes).
        in_specs=[pl.BlockSpec(memory_space=pltpu.MemorySpace.VMEM)] * len(args),
        out_specs=pl.BlockSpec(memory_space=pltpu.MemorySpace.VMEM),
    )(*args)
    return out_padded[:, :output_size]


# ----------------------------- reference ------------------------------------


def mlp_reference(x, params):
    b = x.shape[0]
    y = x.reshape(b, -1).astype(jnp.float32)
    w0, b0 = params["linears"][0]
    y = y @ w0.T + b0
    for i, (gamma, beta) in enumerate(params["bns"]):
        mean = jnp.mean(y, axis=0, keepdims=True)
        var = jnp.mean((y - mean) ** 2, axis=0, keepdims=True)
        z = (y - mean) / jnp.sqrt(var + EPS)
        z = jnp.maximum(gamma * z + beta, 0.0)
        w, bias = params["linears"][i + 1]
        y = z @ w.T + bias
    return y


# ----------------------------- main -----------------------------------------


if __name__ == "__main__":
    key = jax.random.PRNGKey(0)
    k_x, k_p = jax.random.split(key)

    batch = 8
    input_size = 32      # forward sees x.reshape(B, -1) -> 4*8 = 32 features
    num_layers = 3
    hidden = 32
    output_size = 8

    # Raw input has extra dims, like the PyTorch module expects (it flattens).
    x = jax.random.normal(k_x, (batch, 4, 8), jnp.float32)
    params = init_mlp_params(k_p, input_size, num_layers, hidden, output_size)
    kparams = prepare_kernel_params(params)   # one-time layout prep (transpose + pad)

    out = mlp_forward(x, kparams, output_size=output_size)
    out = jax.block_until_ready(out)

    ref = mlp_reference(x, params)
    assert out.shape == (batch, output_size), out.shape
    assert jnp.allclose(out, ref, atol=1e-4, rtol=1e-4), (
        float(jnp.max(jnp.abs(out - ref)))
    )

    print("KERNEL_OK")
</pallas_src>

<mosaic_0001>
module attributes {stable_mosaic.version = 11 : i64} {
  func.func @_mlp_kernel(%arg0: memref<8x32xf32, #tpu.memory_space<vmem>>, %arg1: memref<32x32xf32, #tpu.memory_space<vmem>>, %arg2: memref<1x32xf32, #tpu.memory_space<vmem>>, %arg3: memref<1x32xf32, #tpu.memory_space<vmem>>, %arg4: memref<1x32xf32, #tpu.memory_space<vmem>>, %arg5: memref<32x32xf32, #tpu.memory_space<vmem>>, %arg6: memref<1x32xf32, #tpu.memory_space<vmem>>, %arg7: memref<1x32xf32, #tpu.memory_space<vmem>>, %arg8: memref<1x32xf32, #tpu.memory_space<vmem>>, %arg9: memref<32x32xf32, #tpu.memory_space<vmem>>, %arg10: memref<1x32xf32, #tpu.memory_space<vmem>>, %arg11: memref<1x32xf32, #tpu.memory_space<vmem>>, %arg12: memref<1x32xf32, #tpu.memory_space<vmem>>, %arg13: memref<32x128xf32, #tpu.memory_space<vmem>>, %arg14: memref<1x128xf32, #tpu.memory_space<vmem>>, %arg15: memref<8x128xf32, #tpu.memory_space<vmem>>) attributes {dimension_semantics = [], scalar_prefetch = 0 : i64, scratch_operands = 0 : i64, tpu.core_type = #tpu.core_type<tc>} {
    %c0 = arith.constant 0 : index
    %c0_0 = arith.constant 0 : index
    %0 = vector.load %arg0[%c0, %c0_0] : memref<8x32xf32, #tpu.memory_space<vmem>>, vector<8x32xf32>
    %c0_1 = arith.constant 0 : index
    %c0_2 = arith.constant 0 : index
    %1 = vector.load %arg1[%c0_1, %c0_2] : memref<32x32xf32, #tpu.memory_space<vmem>>, vector<32x32xf32>
    %cst = arith.constant dense<0.000000e+00> : vector<8x32xf32>
    %2 = tpu.matmul %0, %1, %cst {dimension_numbers = #tpu.dot_dimension_numbers<[1], [0], [0], [1], [0, 0, 1, 1], [], []>} : vector<8x32xf32>, vector<32x32xf32>, vector<8x32xf32> -> vector<8x32xf32>
    %c0_3 = arith.constant 0 : index
    %c0_4 = arith.constant 0 : index
    %3 = vector.load %arg2[%c0_3, %c0_4] : memref<1x32xf32, #tpu.memory_space<vmem>>, vector<1x32xf32>
    %4 = vector.broadcast %3 : vector<1x32xf32> to vector<8x32xf32>
    %5 = arith.addf %2, %4 : vector<8x32xf32>
    %c0_5 = arith.constant 0 : index
    %c0_6 = arith.constant 0 : index
    %6 = vector.load %arg3[%c0_5, %c0_6] : memref<1x32xf32, #tpu.memory_space<vmem>>, vector<1x32xf32>
    %c0_7 = arith.constant 0 : index
    %c0_8 = arith.constant 0 : index
    %7 = vector.load %arg4[%c0_7, %c0_8] : memref<1x32xf32, #tpu.memory_space<vmem>>, vector<1x32xf32>
    %c0_9 = arith.constant 0 : index
    %c0_10 = arith.constant 0 : index
    %8 = vector.load %arg5[%c0_9, %c0_10] : memref<32x32xf32, #tpu.memory_space<vmem>>, vector<32x32xf32>
    %c0_11 = arith.constant 0 : index
    %c0_12 = arith.constant 0 : index
    %9 = vector.load %arg6[%c0_11, %c0_12] : memref<1x32xf32, #tpu.memory_space<vmem>>, vector<1x32xf32>
    %cst_13 = arith.constant dense<0.000000e+00> : vector<32xf32>
    %10 = vector.multi_reduction <add>, %5, %cst_13 [0] : vector<8x32xf32> to vector<32xf32>
    %11 = vector.shape_cast %10 : vector<32xf32> to vector<1x32xf32>
    %cst_14 = arith.constant 1.250000e-01 : f32
    %12 = vector.broadcast %cst_14 : f32 to vector<1x32xf32>
    %13 = arith.mulf %11, %12 : vector<1x32xf32>
    %14 = arith.mulf %5, %5 : vector<8x32xf32>
    %cst_15 = arith.constant dense<0.000000e+00> : vector<32xf32>
    %15 = vector.multi_reduction <add>, %14, %cst_15 [0] : vector<8x32xf32> to vector<32xf32>
    %16 = vector.shape_cast %15 : vector<32xf32> to vector<1x32xf32>
    %cst_16 = arith.constant 1.250000e-01 : f32
    %17 = vector.broadcast %cst_16 : f32 to vector<1x32xf32>
    %18 = arith.mulf %16, %17 : vector<1x32xf32>
    %19 = arith.mulf %13, %13 : vector<1x32xf32>
    %20 = arith.subf %18, %19 : vector<1x32xf32>
    %cst_17 = arith.constant 9.99999974E-6 : f32
    %21 = vector.broadcast %cst_17 : f32 to vector<1x32xf32>
    %22 = arith.addf %20, %21 : vector<1x32xf32>
    %23 = math.rsqrt %22 : vector<1x32xf32>
    %24 = arith.mulf %6, %23 : vector<1x32xf32>
    %25 = arith.mulf %13, %24 : vector<1x32xf32>
    %26 = arith.subf %7, %25 : vector<1x32xf32>
    %27 = vector.broadcast %24 : vector<1x32xf32> to vector<8x32xf32>
    %28 = arith.mulf %5, %27 : vector<8x32xf32>
    %29 = vector.broadcast %26 : vector<1x32xf32> to vector<8x32xf32>
    %30 = arith.addf %28, %29 : vector<8x32xf32>
    %cst_18 = arith.constant 0.000000e+00 : f32
    %31 = vector.broadcast %cst_18 : f32 to vector<8x32xf32>
    %32 = arith.maximumf %30, %31 : vector<8x32xf32>
    %cst_19 = arith.constant dense<0.000000e+00> : vector<8x32xf32>
    %33 = tpu.matmul %32, %8, %cst_19 {dimension_numbers = #tpu.dot_dimension_numbers<[1], [0], [0], [1], [0, 0, 1, 1], [], []>} : vector<8x32xf32>, vector<32x32xf32>, vector<8x32xf32> -> vector<8x32xf32>
    %34 = vector.broadcast %9 : vector<1x32xf32> to vector<8x32xf32>
    %35 = arith.addf %33, %34 : vector<8x32xf32>
    %c0_20 = arith.constant 0 : index
    %c0_21 = arith.constant 0 : index
    %36 = vector.load %arg7[%c0_20, %c0_21] : memref<1x32xf32, #tpu.memory_space<vmem>>, vector<1x32xf32>
    %c0_22 = arith.constant 0 : index
    %c0_23 = arith.constant 0 : index
    %37 = vector.load %arg8[%c0_22, %c0_23] : memref<1x32xf32, #tpu.memory_space<vmem>>, vector<1x32xf32>
    %c0_24 = arith.constant 0 : index
    %c0_25 = arith.constant 0 : index
    %38 = vector.load %arg9[%c0_24, %c0_25] : memref<32x32xf32, #tpu.memory_space<vmem>>, vector<32x32xf32>
    %c0_26 = arith.constant 0 : index
    %c0_27 = arith.constant 0 : index
    %39 = vector.load %arg10[%c0_26, %c0_27] : memref<1x32xf32, #tpu.memory_space<vmem>>, vector<1x32xf32>
    %cst_28 = arith.constant dense<0.000000e+00> : vector<32xf32>
    %40 = vector.multi_reduction <add>, %35, %cst_28 [0] : vector<8x32xf32> to vector<32xf32>
    %41 = vector.shape_cast %40 : vector<32xf32> to vector<1x32xf32>
    %cst_29 = arith.constant 1.250000e-01 : f32
    %42 = vector.broadcast %cst_29 : f32 to vector<1x32xf32>
    %43 = arith.mulf %41, %42 : vector<1x32xf32>
    %44 = arith.mulf %35, %35 : vector<8x32xf32>
    %cst_30 = arith.constant dense<0.000000e+00> : vector<32xf32>
    %45 = vector.multi_reduction <add>, %44, %cst_30 [0] : vector<8x32xf32> to vector<32xf32>
    %46 = vector.shape_cast %45 : vector<32xf32> to vector<1x32xf32>
    %cst_31 = arith.constant 1.250000e-01 : f32
    %47 = vector.broadcast %cst_31 : f32 to vector<1x32xf32>
    %48 = arith.mulf %46, %47 : vector<1x32xf32>
    %49 = arith.mulf %43, %43 : vector<1x32xf32>
    %50 = arith.subf %48, %49 : vector<1x32xf32>
    %cst_32 = arith.constant 9.99999974E-6 : f32
    %51 = vector.broadcast %cst_32 : f32 to vector<1x32xf32>
    %52 = arith.addf %50, %51 : vector<1x32xf32>
    %53 = math.rsqrt %52 : vector<1x32xf32>
    %54 = arith.mulf %36, %53 : vector<1x32xf32>
    %55 = arith.mulf %43, %54 : vector<1x32xf32>
    %56 = arith.subf %37, %55 : vector<1x32xf32>
    %57 = vector.broadcast %54 : vector<1x32xf32> to vector<8x32xf32>
    %58 = arith.mulf %35, %57 : vector<8x32xf32>
    %59 = vector.broadcast %56 : vector<1x32xf32> to vector<8x32xf32>
    %60 = arith.addf %58, %59 : vector<8x32xf32>
    %cst_33 = arith.constant 0.000000e+00 : f32
    %61 = vector.broadcast %cst_33 : f32 to vector<8x32xf32>
    %62 = arith.maximumf %60, %61 : vector<8x32xf32>
    %cst_34 = arith.constant dense<0.000000e+00> : vector<8x32xf32>
    %63 = tpu.matmul %62, %38, %cst_34 {dimension_numbers = #tpu.dot_dimension_numbers<[1], [0], [0], [1], [0, 0, 1, 1], [], []>} : vector<8x32xf32>, vector<32x32xf32>, vector<8x32xf32> -> vector<8x32xf32>
    %64 = vector.broadcast %39 : vector<1x32xf32> to vector<8x32xf32>
    %65 = arith.addf %63, %64 : vector<8x32xf32>
    %c0_35 = arith.constant 0 : index
    %c0_36 = arith.constant 0 : index
    %66 = vector.load %arg11[%c0_35, %c0_36] : memref<1x32xf32, #tpu.memory_space<vmem>>, vector<1x32xf32>
    %c0_37 = arith.constant 0 : index
    %c0_38 = arith.constant 0 : index
    %67 = vector.load %arg12[%c0_37, %c0_38] : memref<1x32xf32, #tpu.memory_space<vmem>>, vector<1x32xf32>
    %c0_39 = arith.constant 0 : index
    %c0_40 = arith.constant 0 : index
    %68 = vector.load %arg13[%c0_39, %c0_40] : memref<32x128xf32, #tpu.memory_space<vmem>>, vector<32x128xf32>
    %c0_41 = arith.constant 0 : index
    %c0_42 = arith.constant 0 : index
    %69 = vector.load %arg14[%c0_41, %c0_42] : memref<1x128xf32, #tpu.memory_space<vmem>>, vector<1x128xf32>
    %cst_43 = arith.constant dense<0.000000e+00> : vector<32xf32>
    %70 = vector.multi_reduction <add>, %65, %cst_43 [0] : vector<8x32xf32> to vector<32xf32>
    %71 = vector.shape_cast %70 : vector<32xf32> to vector<1x32xf32>
    %cst_44 = arith.constant 1.250000e-01 : f32
    %72 = vector.broadcast %cst_44 : f32 to vector<1x32xf32>
    %73 = arith.mulf %71, %72 : vector<1x32xf32>
    %74 = arith.mulf %65, %65 : vector<8x32xf32>
    %cst_45 = arith.constant dense<0.000000e+00> : vector<32xf32>
    %75 = vector.multi_reduction <add>, %74, %cst_45 [0] : vector<8x32xf32> to vector<32xf32>
    %76 = vector.shape_cast %75 : vector<32xf32> to vector<1x32xf32>
    %cst_46 = arith.constant 1.250000e-01 : f32
    %77 = vector.broadcast %cst_46 : f32 to vector<1x32xf32>
    %78 = arith.mulf %76, %77 : vector<1x32xf32>
    %79 = arith.mulf %73, %73 : vector<1x32xf32>
    %80 = arith.subf %78, %79 : vector<1x32xf32>
    %cst_47 = arith.constant 9.99999974E-6 : f32
    %81 = vector.broadcast %cst_47 : f32 to vector<1x32xf32>
    %82 = arith.addf %80, %81 : vector<1x32xf32>
    %83 = math.rsqrt %82 : vector<1x32xf32>
    %84 = arith.mulf %66, %83 : vector<1x32xf32>
    %85 = arith.mulf %73, %84 : vector<1x32xf32>
    %86 = arith.subf %67, %85 : vector<1x32xf32>
    %87 = vector.broadcast %84 : vector<1x32xf32> to vector<8x32xf32>
    %88 = arith.mulf %65, %87 : vector<8x32xf32>
    %89 = vector.broadcast %86 : vector<1x32xf32> to vector<8x32xf32>
    %90 = arith.addf %88, %89 : vector<8x32xf32>
    %cst_48 = arith.constant 0.000000e+00 : f32
    %91 = vector.broadcast %cst_48 : f32 to vector<8x32xf32>
    %92 = arith.maximumf %90, %91 : vector<8x32xf32>
    %cst_49 = arith.constant dense<0.000000e+00> : vector<8x128xf32>
    %93 = tpu.matmul %92, %68, %cst_49 {dimension_numbers = #tpu.dot_dimension_numbers<[1], [0], [0], [1], [0, 0, 1, 1], [], []>} : vector<8x32xf32>, vector<32x128xf32>, vector<8x128xf32> -> vector<8x128xf32>
    %94 = vector.broadcast %69 : vector<1x128xf32> to vector<8x128xf32>
    %95 = arith.addf %93, %94 : vector<8x128xf32>
    %c0_50 = arith.constant 0 : index
    %c0_51 = arith.constant 0 : index
    %96 = vector.load %arg15[%c0_50, %c0_51] : memref<8x128xf32, #tpu.memory_space<vmem>>, vector<8x128xf32>
    tpu.vector_store %arg15[%c0_50, %c0_51], %95 {strides = array<i32>} : memref<8x128xf32, #tpu.memory_space<vmem>>, vector<8x128xf32>,
    return
  }
}

</mosaic_0001>

<bundles_post_ra>
// kernel: mlp_forward.1
= control target key start
LH: loop header
LB: loop body
LE: loop exit
PB: predicated region body
PF: predicated region fallthrough
CT: control target
= control target key end

     0   :  { %s1144_s0 = inlined_call_operand.vmem [shape: f32[8,32], index: 0, kind: input, shape index: {}]   ;;  %s1145_s1 = inlined_call_operand.vmem [shape: f32[32,32], index: 1, kind: input, shape index: {}]   ;;  %s1146_s2 = inlined_call_operand.vmem [shape: f32[1,32], index: 2, kind: input, shape index: {}]   ;;  %s1147_s3 = inlined_call_operand.vmem [shape: f32[1,32], index: 3, kind: input, shape index: {}]   ;;  %s1148_s4 = inlined_call_operand.hbm [shape: f32[1,32], index: 4, kind: input, shape index: {}]   ;;  %s1149_s5 = inlined_call_operand.hbm [shape: f32[32,32], index: 5, kind: input, shape index: {}]   ;;  %s1150_s6 = inlined_call_operand.hbm [shape: f32[1,32], index: 6, kind: input, shape index: {}]   ;;  %s1151_s7 = inlined_call_operand.hbm [shape: f32[1,32], index: 7, kind: input, shape index: {}]   ;;  %s1152_s8 = inlined_call_operand.hbm [shape: f32[1,32], index: 8, kind: input, shape index: {}]   ;;  %s1153_s9 = inlined_call_operand.vmem [shape: f32[32,32], index: 9, kind: input, shape index: {}]   ;;  %s1154_s10 = inlined_call_operand.vmem [shape: f32[1,32], index: 10, kind: input, shape index: {}]   ;;  %s1155_s11 = inlined_call_operand.vmem [shape: f32[1,32], index: 11, kind: input, shape index: {}]   ;;  %s1156_s12 = inlined_call_operand.vmem [shape: f32[1,32], index: 12, kind: input, shape index: {}]   ;;  %s1157_s13 = inlined_call_operand.hbm [shape: f32[32,128], index: 13, kind: input, shape index: {}]   ;;  %s1158_s14 = inlined_call_operand.vmem [shape: f32[1,128], index: 14, kind: input, shape index: {}]   ;;  %s1159_s15 = inlined_call_operand.hbm [shape: f32[8,128], index: 15, kind: output, shape index: {}]  }
   0x1   :  { %1161 = sst [smem:[#allocation19_spill]] %s1159_s15 }
   0x2   :  { %20 = vsyncpa [#allocation3], 0 }
   0x3   :  { %21 = vsyncpa [#allocation6], 0 }
   0x4   :  { %22 = vsyncpa [#allocation9], 0 }
   0x5   :  { %23 = vsyncpa [#allocation12], 0 }
   0x6   :  { %24 = vsyncpa [#allocation4], 0  ;;  %s883_s18 = smov [#allocation5]   ;;  %s719_s22 = scalar_lea.hbm %s1149_s5, 512 }
   0x7   :  { %s48_s19 = sshll.u32 %s883_s18, 4  ;;  %p720_p0 = scmp.ne.s32.totalorder %s1149_s5, %s719_s22  ;;  %s49_s19 = int_to_ptr.vmem [resolvable:$true] %s48_s19 }
   0x8   :  { %p723_p1 = scmp.lt.u32.totalorder %s719_s22, %s1149_s5 }
   0xa   :  { %p725_p2 = pnand %p723_p1, %p720_p0 }
   0xc   :  { %728 = shalt.err (!%p725_p2)
}
   0xd   :  { %s729_s27 = scalar_lea.vmem %s49_s19, 512  ;;  %p734_p4 = scmp.lt.s32.totalorder %s49_s19, %s49_s19 }
   0xe   :  { %p730_p3 = scmp.ne.s32.totalorder %s49_s19, %s729_s27  ;;  %p735_p5 = scmp.lt.s32.totalorder %s729_s27, %s729_s27 }
  0x10   :  { %p736_p6 = por %p735_p5, %p734_p4 }
  0x12   :  { %p737_p7 = pnand %p736_p6, %p730_p3 }
  0x14   :  { %740 = shalt.err (!%p737_p7)
}
  0x15   :  { %s884_s28 = smov 128   ;;  %s885_s29 = smov 8  }
  0x16   :  { %54 = dma.hbm_to_vmem [thread:$0]  %s1149_s5, 512, %s49_s19, [#allocation6], %s884_s28, %s884_s28, %s885_s29  }
  0x17   :  { %s886_s17 = smov [#allocation8]   ;;  %s887_s20 = smov [#allocation2]  }
  0x18   :  { %s71_s18 = sshll.u32 %s886_s17, 4  ;;  %s39_s21 = sshll.u32 %s887_s20, 4  ;;  %s72_s18 = int_to_ptr.vmem [resolvable:$true] %s71_s18  ;;  %s40_s21 = int_to_ptr.vmem [resolvable:$true] %s39_s21 }
  0x19   :  { %s741_s24 = scalar_lea.hbm %s1151_s7, 16 }
  0x1a   :  { %p742_p8 = scmp.ne.s32.totalorder %s1151_s7, %s741_s24  ;;  %p745_p9 = scmp.lt.u32.totalorder %s741_s24, %s1151_s7 }
  0x1c   :  { %p747_p10 = pnand %p745_p9, %p742_p8 }
  0x1e   :  { %750 = shalt.err (!%p747_p10)
}
  0x1f   :  { %s751_s5 = scalar_lea.vmem %s72_s18, 16  ;;  %s755_s19 = scalar_lea.vmem %s72_s18, 32 }
  0x20   :  { %p752_p11 = scmp.ne.s32.totalorder %s72_s18, %s751_s5  ;;  %p756_p12 = scmp.lt.s32.totalorder %s72_s18, %s72_s18 }
  0x21   :  { %p757_p13 = scmp.lt.s32.totalorder %s755_s19, %s751_s5 }
  0x23   :  { %p758_p0 = por %p757_p13, %p756_p12 }
  0x25   :  { %p759_p1 = pnand %p758_p0, %p752_p11 }
  0x27   :  { %762 = shalt.err (!%p759_p1)
}
  0x28   :  { %74 = dma.hbm_to_vmem [thread:$0]  %s1151_s7, 16, %s72_s18, [#allocation9]  }
  0x29   :  { %s763_s15 = scalar_lea.hbm %s1148_s4, 16 }
  0x2a   :  { %p764_p2 = scmp.ne.s32.totalorder %s1148_s4, %s763_s15  ;;  %p767_p3 = scmp.lt.u32.totalorder %s763_s15, %s1148_s4 }
  0x2c   :  { %p769_p4 = pnand %p767_p3, %p764_p2 }
  0x2e   :  { %772 = shalt.err (!%p769_p4)
}
  0x2f   :  { %s773_s26 = scalar_lea.vmem %s40_s21, 16  ;;  %s777_s27 = scalar_lea.vmem %s40_s21, 32 }
  0x30   :  { %p774_p5 = scmp.ne.s32.totalorder %s40_s21, %s773_s26  ;;  %p778_p6 = scmp.lt.s32.totalorder %s40_s21, %s40_s21 }
  0x31   :  { %p779_p7 = scmp.lt.s32.totalorder %s777_s27, %s773_s26 }
  0x33   :  { %p780_p8 = por %p779_p7, %p778_p6 }
  0x35   :  { %p781_p9 = pnand %p780_p8, %p774_p5 }
  0x37   :  { %784 = shalt.err (!%p781_p9)
}
  0x38   :  { %42 = dma.hbm_to_vmem [thread:$0]  %s1148_s4, 16, %s40_s21, [#allocation3]  }
  0x39   :  { %s888_s5 = smov [#allocation7]   ;;  %s889_s30 = smov [#allocation10]  }
  0x3a   :  { %s61_s19 = sshll.u32 %s888_s5, 4  ;;  %s81_s16 = sshll.u32 %s889_s30, 4  ;;  %s62_s19 = int_to_ptr.vmem [resolvable:$true] %s61_s19  ;;  %s82_s16 = int_to_ptr.vmem [resolvable:$true] %s81_s16 }
  0x3b   :  { %s785_s15 = scalar_lea.hbm %s1150_s6, 16 }
  0x3c   :  { %p786_p10 = scmp.ne.s32.totalorder %s1150_s6, %s785_s15  ;;  %p789_p11 = scmp.lt.u32.totalorder %s785_s15, %s1150_s6 }
  0x3e   :  { %p791_p12 = pnand %p789_p11, %p786_p10 }
  0x40   :  { %794 = shalt.err (!%p791_p12)
}
  0x41   :  { %s795_s4 = scalar_lea.vmem %s62_s19, 16  ;;  %s799_s21 = scalar_lea.vmem %s62_s19, 32 }
  0x42   :  { %p796_p13 = scmp.ne.s32.totalorder %s62_s19, %s795_s4  ;;  %p800_p0 = scmp.lt.s32.totalorder %s62_s19, %s62_s19 }
  0x43   :  { %p801_p1 = scmp.lt.s32.totalorder %s799_s21, %s795_s4 }
  0x45   :  { %p802_p2 = por %p801_p1, %p800_p0 }
  0x47   :  { %p803_p3 = pnand %p802_p2, %p796_p13 }
  0x49   :  { %806 = shalt.err (!%p803_p3)
}
  0x4a   :  { %64 = dma.hbm_to_vmem [thread:$0]  %s1150_s6, 16, %s62_s19, [#allocation6]  }
  0x4b   :  { %s807_s5 = scalar_lea.hbm %s1152_s8, 16 }
  0x4c   :  { %p808_p4 = scmp.ne.s32.totalorder %s1152_s8, %s807_s5  ;;  %p811_p5 = scmp.lt.u32.totalorder %s807_s5, %s1152_s8 }
  0x4e   :  { %p813_p6 = pnand %p811_p5, %p808_p4 }
  0x50   :  { %816 = shalt.err (!%p813_p6)
}
  0x51   :  { %s817_s22 = scalar_lea.vmem %s82_s16, 16  ;;  %s821_s23 = scalar_lea.vmem %s82_s16, 32 }
  0x52   :  { %p818_p7 = scmp.ne.s32.totalorder %s82_s16, %s817_s22  ;;  %p822_p8 = scmp.lt.s32.totalorder %s82_s16, %s82_s16 }
  0x53   :  { %p823_p9 = scmp.lt.s32.totalorder %s821_s23, %s817_s22 }
  0x55   :  { %p824_p10 = por %p823_p9, %p822_p8 }
  0x57   :  { %p825_p11 = pnand %p824_p10, %p818_p7 }
  0x59   :  { %828 = shalt.err (!%p825_p11)
}
  0x5a   :  { %84 = dma.hbm_to_vmem [thread:$0]  %s1152_s8, 16, %s82_s16, [#allocation9]  }
  0x5b   :  { %s890_s24 = smov [#allocation11]   ;;  %s829_s26 = scalar_lea.hbm %s1157_s13, 512 }
  0x5c   :  { %s98_s25 = sshll.u32 %s890_s24, 4  ;;  %p830_p12 = scmp.ne.s32.totalorder %s1157_s13, %s829_s26  ;;  %s99_s25 = int_to_ptr.vmem [resolvable:$true] %s98_s25 }
  0x5d   :  { %p833_p13 = scmp.lt.u32.totalorder %s829_s26, %s1157_s13 }
  0x5f   :  { %p835_p0 = pnand %p833_p13, %p830_p12 }
  0x61   :  { %838 = shalt.err (!%p835_p0)
}
  0x62   :  { %s839_s30 = scalar_lea.vmem %s99_s25, 512  ;;  %p844_p2 = scmp.lt.s32.totalorder %s99_s25, %s99_s25 }
  0x63   :  { %p840_p1 = scmp.ne.s32.totalorder %s99_s25, %s839_s30  ;;  %p845_p3 = scmp.lt.s32.totalorder %s839_s30, %s839_s30 }
  0x65   :  { %p846_p4 = por %p845_p3, %p844_p2 }
  0x67   :  { %p847_p5 = pnand %p846_p4, %p840_p1 }
  0x69   :  { %850 = shalt.err (!%p847_p5)
}
  0x6a   :  { %104 = dma.hbm_to_vmem [thread:$0]  %s1157_s13, 512, %s99_s25, [#allocation12], %s884_s28, %s884_s28, %s885_s29  }
  0x6b   :  { %873 = dma.done.wait [#allocation3], 16  }
  0x6c   :  { %874 = vsyncadd [#allocation3], 4294967280 }
  0x6d   :  { %875 = dma.done.wait [#allocation6], 528  }
  0x6e   :  { %876 = vsyncadd [#allocation6], 4294966768 }
  0x6f   :  { %877 = dma.done.wait [#allocation9], 32  }
  0x70   :  { %878 = vsyncadd [#allocation9], 4294967264 }
  0x71   :  { %879 = dma.done.wait [#allocation12], 512  }
  0x72   :  { %880 = vsyncadd [#allocation12], 4294966784  ;;  %v891_v0 = vmov 0.0|0.0   ;;  %vm892_vm0 = vmmov 0   ;;  %v893_v1 = vmov 0.0   ;;  %v126_v2 = vld [vmem:[%s1145_s1] sm:$0xff]  ;;  %v243_v39 = vlaneseq }
  0x73   :  { %677 = vmatprep.subr.bf16.mxu0 %v891_v0  ;;  %641 = vmatprep.mubr.msk.f32.mxu0 %vm892_vm0, %v893_v1  ;;  %v127_v3 = vld [vmem:[%s1145_s1 + $0x8] sm:$0xff]  ;;  %v128_v4 = vld [vmem:[%s1145_s1 + $0x10] sm:$0xff]  ;;  %v129_v6 = vld [vmem:[%s1145_s1 + $0x18] sm:$0xff]  ;;  %vm137_vm1 = vcmask 261120  }
  0x74   :  { %683 = vmatprep.subr.bf16.mxu1 %v891_v0  ;;  %652 = vmatprep.mubr.msk.f32.mxu1 %vm892_vm0, %v893_v1  ;;  %v678_v5 = vpack.c.bf16 %v127_v3, %v126_v2  ;;  %v681_v7 = vpack.c.bf16 %v129_v6, %v128_v4  ;;  %v125_v8 = vld [vmem:[%s1144_s0] sm:$0xff]  ;;  %v213_v9 = vld [vmem:[#allocation5] sm:$0xff]  ;;  %v214_v10 = vld [vmem:[#allocation5 + $0x8] sm:$0xff]  ;;  %v244_v40 = vshrl.u32 %v243_v39, 7 }
  0x75   :  { %v684_v11 = vpack.c.bf16 %v214_v10, %v213_v9  ;;  %v215_v12 = vld [vmem:[#allocation5 + $0x10] sm:$0xff]  ;;  %v216_v13 = vld [vmem:[#allocation5 + $0x18] sm:$0xff]  ;;  %v340_v56 = vld [vmem:[%s1153_s9 + $0x10] sm:$0xff] }
  0x76   :  { %679 = vmatpush3.bf16.msra.mxu0 %v678_v5  ;;  %v687_v14 = vpack.c.bf16 %v216_v13, %v215_v12  ;;  %v605_v15 = vld [vmem:[%s1146_s2] ss:$0 sm:$0xff]  ;;  %v1089_v42 = vsub.s32 0, %v244_v40  ;;  %v212_v45 = vld [vmem:[#allocation2] sm:$0x1]  ;;  %v341_v57 = vld [vmem:[%s1153_s9 + $0x18] sm:$0xff] }
  0x77   :  { %680 = vmatprep.subr.bf16.mxu0 %v891_v0  ;;  %685 = vmatpush3.bf16.msra.mxu1 %v684_v11  ;;  %v211_v41 = vld [vmem:[%s1147_s3] sm:$0x1]  ;;  %v339_v54 = vld [vmem:[%s1153_s9 + $0x8] sm:$0xff]  ;;  %v693_v58 = vpack.c.bf16 %v341_v57, %v340_v56 }
  0x78   :  { %686 = vmatprep.subr.bf16.mxu1 %v891_v0  ;;  %v338_v53 = vld [vmem:[%s1153_s9] sm:$0xff]  ;;  %v607_v59 = vld [vmem:[#allocation7] ss:$0 sm:$0xff] }
  0x79   :  { %v690_v55 = vpack.c.bf16 %v339_v54, %v338_v53 }
  0x7a   :  { %682 = vmatpush3.bf16.msra.mxu0 %v681_v7 }
  0x7b   :  { %689 = vmatprep.subr.bf16.mxu0 %v891_v0  ;;  %688 = vmatpush3.bf16.msra.mxu1 %v687_v14 }
  0x7c   :  { %695 = vmatprep.subr.bf16.mxu1 %v891_v0 }
  0x7d   :  { %642 = vmatmul.mubr.msk.f32.vlgmr.msra.gmra.mrb[0].mxu0 %vm137_vm1, %v125_v8 }
  0x7e   :  { %663 = vmatprep.mubr.msk.f32.mxu0 %vm892_vm0, %v893_v1  ;;  %691 = vmatpush3.bf16.msra.mxu0 %v690_v55 }
  0x7f   :  { %692 = vmatprep.subr.bf16.mxu0 %v891_v0 }
  0x82   :  { %694 = vmatpush3.bf16.msra.mxu0 %v693_v58 }
 0x150   :  { %v207_v16 = vpop.f32.mrb[0].mxu0 }
 0x151   :  { %v208_v17 = vadd.f32 %v605_v15, %v207_v16  ;;  %v643_v18 = vpop.f32.mrb[1].mxu0 }
 0x153   :  { %v218_v19 = vsel %vm137_vm1, %v208_v17, 0.0  ;;  %v226_v20 = vmul.f32 %v208_v17, %v208_v17 }
 0x154   :  { %v219_v21 = vrot.slane %v218_v19, 4 }
 0x155   :  { %v227_v22 = vsel %vm137_vm1, %v226_v20, 0.0  ;;  %v336_v20 = vld [vmem:[#allocation8] sm:$0x1] }
 0x156   :  { %v220_v23 = vadd.f32 %v219_v21, %v218_v19  ;;  %v228_v24 = vrot.slane %v227_v22, 4 }
 0x158   :  { %v221_v25 = vrot.slane %v220_v23, 2  ;;  %v229_v26 = vadd.f32 %v228_v24, %v227_v22 }
 0x15a   :  { %v222_v27 = vadd.f32 %v221_v25, %v220_v23  ;;  %v230_v28 = vrot.slane %v229_v26, 2  ;;  %v337_v23 = vld [vmem:[#allocation10] sm:$0x1] }
 0x15c   :  { %v223_v29 = vrot.slane %v222_v27, 1  ;;  %v231_v30 = vadd.f32 %v230_v28, %v229_v26 }
 0x15e   :  { %v224_v31 = vadd.f32 %v223_v29, %v222_v27  ;;  %v232_v32 = vrot.slane %v231_v30, 1 }
 0x160   :  { %v225_v33 = vmul.f32 0.125, %v224_v31  ;;  %v233_v34 = vadd.f32 %v232_v32, %v231_v30  ;;  %v463_v31 = vld [vmem:[#allocation11] sm:$0xff]  ;;  %v464_v32 = vld [vmem:[#allocation11 + $0x8] sm:$0xff] }
 0x162   :  { %v234_v35 = vmul.f32 0.125, %v233_v34  ;;  %v235_v36 = vmul.f32 %v225_v33, %v225_v33  ;;  %v465_v34 = vld [vmem:[#allocation11 + $0x10] sm:$0xff] }
 0x164   :  { %v236_v37 = vsub.f32 %v234_v35, %v235_v36  ;;  %v466_v35 = vld [vmem:[#allocation11 + $0x18] sm:$0xff] }
 0x165   :  { %v699_v36 = vpack.c.bf16 %v466_v35, %v465_v34 }
 0x166   :  { %v237_v38 = vadd.f32 1e-05, %v236_v37  ;;  %v609_v37 = vld [vmem:[%s1154_s10] ss:$0 sm:$0xff] }
 0x168   :  { %713 = vrsqrt.f32 %v237_v38 }
 0x172   :  { %v714_v43 = vpop.eup %713 }
 0x173   :  { %v239_v44 = vmul.f32 %v714_v43, %v211_v41 }
 0x175   :  { %v240_v46 = vmul.f32 %v239_v44, %v225_v33  ;;  %v246_v47 = vrot.slane %v239_v44, %v1089_v42  ;;  %v696_v33 = vpack.c.bf16 %v464_v32, %v463_v31 }
 0x177   :  { %v241_v48 = vsub.f32 %v212_v45, %v240_v46  ;;  %v248_v49 = vmul.f32 %v246_v47, %v208_v17 }
 0x179   :  { %v253_v50 = vrot.slane %v241_v48, %v1089_v42 }
 0x17b   :  { %v255_v51 = vadd.f32 %v253_v50, %v248_v49 }
 0x17d   :  { %v256_v52 = vmax.f32 %v255_v51, 0.0 }
 0x17f   :  { %653 = vmatmul.mubr.msk.f32.vlgmr.msra.gmra.mrb[0].mxu1 %vm137_vm1, %v256_v52 }
 0x180   :  { %674 = vmatprep.mubr.msk.f32.mxu1 %vm892_vm0, %v893_v1  ;;  %697 = vmatpush3.bf16.msra.mxu1 %v696_v33 }
 0x181   :  { %698 = vmatprep.subr.bf16.mxu1 %v891_v0 }
 0x184   :  { %700 = vmatpush3.bf16.msra.mxu1 %v699_v36 }
 0x252   :  { %v332_v60 = vpop.f32.mrb[0].mxu1 }
 0x253   :  { %v333_v61 = vadd.f32 %v607_v59, %v332_v60  ;;  %v654_v62 = vpop.f32.mrb[1].mxu1 }
 0x255   :  { %v343_v63 = vsel %vm137_vm1, %v333_v61, 0.0  ;;  %v351_v1 = vmul.f32 %v333_v61, %v333_v61 }
 0x256   :  { %v344_v2 = vrot.slane %v343_v63, 4 }
 0x257   :  { %v352_v3 = vsel %vm137_vm1, %v351_v1, 0.0  ;;  %v462_v1 = vld [vmem:[%s1156_s12] sm:$0x1] }
 0x258   :  { %v345_v4 = vadd.f32 %v344_v2, %v343_v63  ;;  %v353_v5 = vrot.slane %v352_v3, 4 }
 0x25a   :  { %v346_v6 = vrot.slane %v345_v4, 2  ;;  %v354_v7 = vadd.f32 %v353_v5, %v352_v3 }
 0x25c   :  { %v347_v8 = vadd.f32 %v346_v6, %v345_v4  ;;  %v355_v9 = vrot.slane %v354_v7, 2 }
 0x25e   :  { %v348_v10 = vrot.slane %v347_v8, 1  ;;  %v356_v11 = vadd.f32 %v355_v9, %v354_v7  ;;  %v611_v9 = vld [vmem:[%s1158_s14] ss:$0 sm:$0xff] }
 0x260   :  { %v349_v12 = vadd.f32 %v348_v10, %v347_v8  ;;  %v357_v13 = vrot.slane %v356_v11, 1 }
 0x262   :  { %v350_v14 = vmul.f32 0.125, %v349_v12  ;;  %v358_v15 = vadd.f32 %v357_v13, %v356_v11 }
 0x264   :  { %v359_v16 = vmul.f32 0.125, %v358_v15  ;;  %v360_v17 = vmul.f32 %v350_v14, %v350_v14 }
 0x266   :  { %v361_v18 = vsub.f32 %v359_v16, %v360_v17 }
 0x268   :  { %v362_v19 = vadd.f32 1e-05, %v361_v18 }
 0x26a   :  { %715 = vrsqrt.f32 %v362_v19 }
 0x274   :  { %v716_v21 = vpop.eup %715 }
 0x275   :  { %v364_v22 = vmul.f32 %v716_v21, %v336_v20 }
 0x277   :  { %v365_v24 = vmul.f32 %v364_v22, %v350_v14  ;;  %v371_v25 = vrot.slane %v364_v22, %v1089_v42 }
 0x279   :  { %v366_v26 = vsub.f32 %v337_v23, %v365_v24  ;;  %v373_v27 = vmul.f32 %v371_v25, %v333_v61  ;;  %v461_v61 = vld [vmem:[%s1155_s11] sm:$0x1]  ;;  %s894_s11 = smov [#allocation13]  }
 0x27a   :  { %s593_s29 = sshll.u32 %s894_s11, 4  ;;  %s594_s29 = int_to_ptr.vmem [resolvable:$true] %s593_s29 }
 0x27b   :  { %v378_v28 = vrot.slane %v366_v26, %v1089_v42  ;;  %s851_s12 = scalar_lea.vmem %s594_s29, 128  ;;  %p856_p7 = scmp.lt.s32.totalorder %s594_s29, %s594_s29 }
 0x27c   :  { %p852_p6 = scmp.ne.s32.totalorder %s594_s29, %s851_s12  ;;  %p857_p8 = scmp.lt.s32.totalorder %s851_s12, %s851_s12 }
 0x27d   :  { %v380_v29 = vadd.f32 %v378_v28, %v373_v27 }
 0x27e   :  { %p858_p9 = por %p857_p8, %p856_p7 }
 0x27f   :  { %v381_v30 = vmax.f32 %v380_v29, 0.0 }
 0x280   :  { %p859_p10 = pnand %p858_p9, %p852_p6 }
 0x281   :  { %664 = vmatmul.mubr.msk.f32.vlgmr.msra.gmra.mrb[2].mxu0 %vm137_vm1, %v381_v30 }
 0x354   :  { %v457_v38 = vpop.f32.mrb[2].mxu0 }
 0x355   :  { %v458_v39 = vadd.f32 %v609_v37, %v457_v38  ;;  %v665_v40 = vpop.f32.mrb[3].mxu0 }
 0x357   :  { %v468_v41 = vsel %vm137_vm1, %v458_v39, 0.0  ;;  %v476_v43 = vmul.f32 %v458_v39, %v458_v39 }
 0x358   :  { %v469_v44 = vrot.slane %v468_v41, 4 }
 0x359   :  { %v477_v45 = vsel %vm137_vm1, %v476_v43, 0.0 }
 0x35a   :  { %v470_v46 = vadd.f32 %v469_v44, %v468_v41  ;;  %v478_v47 = vrot.slane %v477_v45, 4 }
 0x35c   :  { %v471_v0 = vrot.slane %v470_v46, 2  ;;  %v479_v48 = vadd.f32 %v478_v47, %v477_v45 }
 0x35e   :  { %v472_v49 = vadd.f32 %v471_v0, %v470_v46  ;;  %v480_v50 = vrot.slane %v479_v48, 2 }
 0x360   :  { %v473_v51 = vrot.slane %v472_v49, 1  ;;  %v481_v52 = vadd.f32 %v480_v50, %v479_v48 }
 0x362   :  { %v474_v53 = vadd.f32 %v473_v51, %v472_v49  ;;  %v482_v54 = vrot.slane %v481_v52, 1 }
 0x364   :  { %v475_v55 = vmul.f32 0.125, %v474_v53  ;;  %v483_v56 = vadd.f32 %v482_v54, %v481_v52 }
 0x366   :  { %v484_v57 = vmul.f32 0.125, %v483_v56  ;;  %v485_v58 = vmul.f32 %v475_v55, %v475_v55 }
 0x368   :  { %v486_v59 = vsub.f32 %v484_v57, %v485_v58 }
 0x36a   :  { %v487_v60 = vadd.f32 1e-05, %v486_v59 }
 0x36c   :  { %717 = vrsqrt.f32 %v487_v60 }
 0x376   :  { %v718_v62 = vpop.eup %717 }
 0x377   :  { %v489_v63 = vmul.f32 %v718_v62, %v461_v61 }
 0x379   :  { %v490_v2 = vmul.f32 %v489_v63, %v475_v55  ;;  %v496_v3 = vrot.slane %v489_v63, %v1089_v42 }
 0x37b   :  { %v491_v4 = vsub.f32 %v462_v1, %v490_v2  ;;  %v498_v5 = vmul.f32 %v496_v3, %v458_v39 }
 0x37d   :  { %v503_v6 = vrot.slane %v491_v4, %v1089_v42 }
 0x37f   :  { %v505_v7 = vadd.f32 %v503_v6, %v498_v5 }
 0x381   :  { %v506_v8 = vmax.f32 %v505_v7, 0.0 }
 0x383   :  { %675 = vmatmul.mubr.msk.f32.vlgmr.msra.gmra.mrb[2].mxu1 %vm137_vm1, %v506_v8 }
 0x456   :  { %v582_v10 = vpop.f32.mrb[2].mxu1 }
 0x457   :  { %v583_v11 = vadd.f32 %v611_v9, %v582_v10  ;;  %v676_v12 = vpop.f32.mrb[3].mxu1 }
 0x459   :  { %586 = vst [vmem:[#allocation13] sm:$0xff] %v583_v11 }
 0x45a   :  { %862 = shalt.err (!%p859_p10)
}
 0x45b   :  { %s1162_s15 = sld [smem:[#allocation19_spill]] }
 0x461   :  { %s863_s22 = scalar_lea.hbm %s1162_s15, 128 }
 0x462   :  { %p864_p11 = scmp.ne.s32.totalorder %s1162_s15, %s863_s22  ;;  %p867_p12 = scmp.lt.u32.totalorder %s863_s22, %s1162_s15 }
 0x464   :  { %p869_p13 = pnand %p867_p12, %p864_p11 }
 0x466   :  { %872 = shalt.err (!%p869_p13)
}
 0x467   :  { %596 = dma.vmem_to_hbm [thread:$0]  %s594_s29, 128, %s1162_s15, [#allocation4]  }
 0x468   :  { %881 = dma.done.wait [#allocation4], 128  }
 0x469   :  { %882 = vsyncadd [#allocation4], 4294967168 }
 0x46a   :  { %600 = vsyncpa [#allocation3], 1 }
 0x46b   :  { %601 = vsyncpa [#allocation6], 1 }
 0x46c   :  { %602 = vsyncpa [#allocation9], 1 }
 0x46d   :  { %603 = vsyncpa [#allocation12], 1 }
 0x46e   :  { %604 = vsyncpa [#allocation4], 1 }

</bundles_post_ra>
